<compile_context>
chip_gen: v5e
topology: v5e:2x2
jax: 0.10.0
libtpu: 0.0.40
codegen_flags: <defaults>
</compile_context>

<pallas_src>
import jax
import jax.numpy as jnp
from jax.experimental import pallas as pl
from jax.experimental.pallas import tpu as pltpu

INPUT_DIM = 28 * 28      # 784 (logical)
INPUT_DIM_PAD = 896      # 7 * 128 padded contraction dim for fc1
HIDDEN1 = 128            # chosen small hidden dims (original reads from stdin)
HIDDEN2 = 64
HIDDEN3 = 32
OUTPUT_DIM = 10
LANE = 128               # TPU lane width; all padded feature dims
TB_MAX = 256             # max batch tile: fills MXU rows on v6e/v7x


def _mlp_kernel(x_ref, w1_ref, b1_ref, w2_ref, b2_ref, w3_ref, b3_ref,
                w4_ref, b4_ref, o_ref):
    # All matmul operands are bf16 (fast MXU path); accumulation and the
    # bias / ReLU / sigmoid math are f32.
    # fc1 + ReLU
    h1 = jnp.dot(x_ref[...], w1_ref[...], preferred_element_type=jnp.float32)
    h1 = jnp.maximum(h1 + b1_ref[...], 0.0)
    # fc2 + Sigmoid
    h2 = jnp.dot(h1.astype(jnp.bfloat16), w2_ref[...],
                 preferred_element_type=jnp.float32)
    h2 = jax.nn.sigmoid(h2 + b2_ref[...])
    # fc3 + ReLU
    h3 = jnp.dot(h2.astype(jnp.bfloat16), w3_ref[...],
                 preferred_element_type=jnp.float32)
    h3 = jnp.maximum(h3 + b3_ref[...], 0.0)
    # out (no activation), lane-padded to 128 columns
    y = jnp.dot(h3.astype(jnp.bfloat16), w4_ref[...],
                preferred_element_type=jnp.float32)
    o_ref[...] = (y + b4_ref[...]).astype(o_ref.dtype)


def _pad_to(a, shape):
    pads = [(0, t - s) for s, t in zip(a.shape, shape)]
    return jnp.pad(a, pads)


def _round_up(n, m):
    return ((n + m - 1) // m) * m


def mlp_forward(x, params, *, tb=None):
    """x: (B, 1, 28, 28) or (B, 784) float32.
    params: unpadded f32 weights (in, out) and biases (1, out).
    Returns (B, 10) float32."""
    w1, b1, w2, b2, w3, b3, w4, b4 = params

    x2d = x.reshape(-1, INPUT_DIM).astype(jnp.float32)
    batch = x2d.shape[0]
    if tb is None:
        # Sublane-aligned tile; cap at TB_MAX so big batches pipeline over a
        # grid, and small batches don't get padded to 256 rows.
        tb = min(TB_MAX, _round_up(max(batch, 1), 8))
    n_tiles = pl.cdiv(batch, tb)
    b_pad = n_tiles * tb

    # Zero-pad to lane / tile multiples and cast matmul operands to bf16.
    xp = _pad_to(x2d, (b_pad, INPUT_DIM_PAD)).astype(jnp.bfloat16)
    w1p = _pad_to(w1, (INPUT_DIM_PAD, HIDDEN1)).astype(jnp.bfloat16)
    b1p = _pad_to(b1, (1, LANE)).astype(jnp.float32)
    w2p = _pad_to(w2, (HIDDEN1, LANE)).astype(jnp.bfloat16)
    b2p = _pad_to(b2, (1, LANE)).astype(jnp.float32)
    w3p = _pad_to(w3, (LANE, LANE)).astype(jnp.bfloat16)
    b3p = _pad_to(b3, (1, LANE)).astype(jnp.float32)
    w4p = _pad_to(w4, (LANE, LANE)).astype(jnp.bfloat16)
    b4p = _pad_to(b4, (1, LANE)).astype(jnp.float32)

    # Batch-tiled x / out; weights & biases pinned with a constant index_map.
    x_spec = pl.BlockSpec((tb, INPUT_DIM_PAD), lambda i: (i, 0))
    out_spec = pl.BlockSpec((tb, LANE), lambda i: (i, 0))

    def const_spec(shape):
        return pl.BlockSpec(shape, lambda i: (0, 0))

    in_specs = [
        x_spec,
        const_spec(w1p.shape), const_spec(b1p.shape),
        const_spec(w2p.shape), const_spec(b2p.shape),
        const_spec(w3p.shape), const_spec(b3p.shape),
        const_spec(w4p.shape), const_spec(b4p.shape),
    ]

    flops = 2 * b_pad * (INPUT_DIM_PAD * HIDDEN1
                         + HIDDEN1 * LANE + LANE * LANE + LANE * LANE)
    weight_bytes = sum(int(a.size * a.dtype.itemsize)
                       for a in (w1p, b1p, w2p, b2p, w3p, b3p, w4p, b4p))
    bytes_accessed = int(xp.size * xp.dtype.itemsize) + weight_bytes \
        + b_pad * LANE * 4
    cost = pl.CostEstimate(flops=flops,
                           transcendentals=b_pad * LANE,   # sigmoid
                           bytes_accessed=bytes_accessed)

    out_padded = pl.pallas_call(
        _mlp_kernel,
        out_shape=jax.ShapeDtypeStruct((b_pad, LANE), jnp.float32),
        grid=(n_tiles,),
        in_specs=in_specs,
        out_specs=out_spec,
        compiler_params=pltpu.CompilerParams(
            dimension_semantics=("parallel",)),
        cost_estimate=cost,
    )(xp, w1p, b1p, w2p, b2p, w3p, b3p, w4p, b4p)

    return out_padded[:batch, :OUTPUT_DIM]


def init_params(key):
    """Deterministic init, same shapes as the PyTorch module (weights stored
    transposed as (in, out); biases kept 2D (1, out))."""
    dims = [(INPUT_DIM, HIDDEN1), (HIDDEN1, HIDDEN2),
            (HIDDEN2, HIDDEN3), (HIDDEN3, OUTPUT_DIM)]
    params = []
    for (fan_in, fan_out) in dims:
        key, kw, kb = jax.random.split(key, 3)
        bound = 1.0 / (fan_in ** 0.5)  # matches nn.Linear default init range
        w = jax.random.uniform(kw, (fan_in, fan_out), jnp.float32, -bound, bound)
        b = jax.random.uniform(kb, (1, fan_out), jnp.float32, -bound, bound)
        params += [w, b]
    return tuple(params)


if __name__ == "__main__":
    key = jax.random.PRNGKey(0)
    key, kx = jax.random.split(key)
    # MNIST-like input: batch=8, NCHW (8, 1, 28, 28)
    x = jax.random.normal(kx, (8, 1, 28, 28), dtype=jnp.float32)
    params = init_params(key)

    out = mlp_forward(x, params)
    jax.block_until_ready(out)

    # Sanity check against plain-JAX f32 reference (loose tol: bf16 operands).
    x2d = x.reshape(-1, INPUT_DIM)
    w1, b1, w2, b2, w3, b3, w4, b4 = params
    ref = jnp.maximum(x2d @ w1 + b1, 0.0)
    ref = jax.nn.sigmoid(ref @ w2 + b2)
    ref = jnp.maximum(ref @ w3 + b3, 0.0)
    ref = ref @ w4 + b4
    assert out.shape == (8, OUTPUT_DIM)
    assert jnp.allclose(out, ref, atol=2e-2, rtol=2e-2)

    print("KERNEL_OK")
</pallas_src>

<mosaic_0001>
module attributes {stable_mosaic.version = 11 : i64} {
  func.func @_mlp_kernel(%arg0: i32, %arg1: memref<8x896xbf16, #tpu.memory_space<vmem>>, %arg2: memref<896x128xbf16, #tpu.memory_space<vmem>>, %arg3: memref<1x128xf32, #tpu.memory_space<vmem>>, %arg4: memref<128x128xbf16, #tpu.memory_space<vmem>>, %arg5: memref<1x128xf32, #tpu.memory_space<vmem>>, %arg6: memref<128x128xbf16, #tpu.memory_space<vmem>>, %arg7: memref<1x128xf32, #tpu.memory_space<vmem>>, %arg8: memref<128x128xbf16, #tpu.memory_space<vmem>>, %arg9: memref<1x128xf32, #tpu.memory_space<vmem>>, %arg10: memref<8x128xf32, #tpu.memory_space<vmem>>) attributes {dimension_semantics = [#tpu.dimension_semantics<parallel>], iteration_bounds = array<i64: 1>, scalar_prefetch = 0 : i64, scratch_operands = 0 : i64, tpu.core_type = #tpu.core_type<tc>, window_params = [{transform_indices = @transform_0, window_bounds = array<i64: 8, 896>}, {pipeline_mode = #tpu.pipeline_mode<synchronous>, transform_indices = @transform_1, window_bounds = array<i64: 896, 128>}, {pipeline_mode = #tpu.pipeline_mode<synchronous>, transform_indices = @transform_2, window_bounds = array<i64: 1, 128>}, {pipeline_mode = #tpu.pipeline_mode<synchronous>, transform_indices = @transform_3, window_bounds = array<i64: 128, 128>}, {pipeline_mode = #tpu.pipeline_mode<synchronous>, transform_indices = @transform_4, window_bounds = array<i64: 1, 128>}, {pipeline_mode = #tpu.pipeline_mode<synchronous>, transform_indices = @transform_5, window_bounds = array<i64: 128, 128>}, {pipeline_mode = #tpu.pipeline_mode<synchronous>, transform_indices = @transform_6, window_bounds = array<i64: 1, 128>}, {pipeline_mode = #tpu.pipeline_mode<synchronous>, transform_indices = @transform_7, window_bounds = array<i64: 128, 128>}, {pipeline_mode = #tpu.pipeline_mode<synchronous>, transform_indices = @transform_8, window_bounds = array<i64: 1, 128>}, {transform_indices = @transform_9, window_bounds = array<i64: 8, 128>}]} {
    %c0 = arith.constant 0 : index
    %c0_0 = arith.constant 0 : index
    %0 = vector.load %arg1[%c0, %c0_0] : memref<8x896xbf16, #tpu.memory_space<vmem>>, vector<8x896xbf16>
    %c0_1 = arith.constant 0 : index
    %c0_2 = arith.constant 0 : index
    %1 = vector.load %arg2[%c0_1, %c0_2] : memref<896x128xbf16, #tpu.memory_space<vmem>>, vector<896x128xbf16>
    %cst = arith.constant dense<0.000000e+00> : vector<8x128xf32>
    %2 = tpu.matmul %0, %1, %cst {dimension_numbers = #tpu.dot_dimension_numbers<[1], [0], [0], [1], [0, 0, 1, 1], [], []>} : vector<8x896xbf16>, vector<896x128xbf16>, vector<8x128xf32> -> vector<8x128xf32>
    %c0_3 = arith.constant 0 : index
    %c0_4 = arith.constant 0 : index
    %3 = vector.load %arg3[%c0_3, %c0_4] : memref<1x128xf32, #tpu.memory_space<vmem>>, vector<1x128xf32>
    %4 = vector.broadcast %3 : vector<1x128xf32> to vector<8x128xf32>
    %5 = arith.addf %2, %4 : vector<8x128xf32>
    %cst_5 = arith.constant 0.000000e+00 : f32
    %6 = vector.broadcast %cst_5 : f32 to vector<8x128xf32>
    %7 = arith.maximumf %5, %6 : vector<8x128xf32>
    %8 = arith.truncf %7 : vector<8x128xf32> to vector<8x128xbf16>
    %c0_6 = arith.constant 0 : index
    %c0_7 = arith.constant 0 : index
    %9 = vector.load %arg4[%c0_6, %c0_7] : memref<128x128xbf16, #tpu.memory_space<vmem>>, vector<128x128xbf16>
    %cst_8 = arith.constant dense<0.000000e+00> : vector<8x128xf32>
    %10 = tpu.matmul %8, %9, %cst_8 {dimension_numbers = #tpu.dot_dimension_numbers<[1], [0], [0], [1], [0, 0, 1, 1], [], []>} : vector<8x128xbf16>, vector<128x128xbf16>, vector<8x128xf32> -> vector<8x128xf32>
    %c0_9 = arith.constant 0 : index
    %c0_10 = arith.constant 0 : index
    %11 = vector.load %arg5[%c0_9, %c0_10] : memref<1x128xf32, #tpu.memory_space<vmem>>, vector<1x128xf32>
    %12 = vector.broadcast %11 : vector<1x128xf32> to vector<8x128xf32>
    %13 = arith.addf %10, %12 : vector<8x128xf32>
    %14 = arith.negf %13 : vector<8x128xf32>
    %15 = math.exp %14 : vector<8x128xf32>
    %cst_11 = arith.constant 1.000000e+00 : f32
    %16 = vector.broadcast %cst_11 : f32 to vector<8x128xf32>
    %17 = arith.addf %16, %15 : vector<8x128xf32>
    %18 = arith.divf %16, %17 : vector<8x128xf32>
    %19 = arith.truncf %18 : vector<8x128xf32> to vector<8x128xbf16>
    %c0_12 = arith.constant 0 : index
    %c0_13 = arith.constant 0 : index
    %20 = vector.load %arg6[%c0_12, %c0_13] : memref<128x128xbf16, #tpu.memory_space<vmem>>, vector<128x128xbf16>
    %cst_14 = arith.constant dense<0.000000e+00> : vector<8x128xf32>
    %21 = tpu.matmul %19, %20, %cst_14 {dimension_numbers = #tpu.dot_dimension_numbers<[1], [0], [0], [1], [0, 0, 1, 1], [], []>} : vector<8x128xbf16>, vector<128x128xbf16>, vector<8x128xf32> -> vector<8x128xf32>
    %c0_15 = arith.constant 0 : index
    %c0_16 = arith.constant 0 : index
    %22 = vector.load %arg7[%c0_15, %c0_16] : memref<1x128xf32, #tpu.memory_space<vmem>>, vector<1x128xf32>
    %23 = vector.broadcast %22 : vector<1x128xf32> to vector<8x128xf32>
    %24 = arith.addf %21, %23 : vector<8x128xf32>
    %cst_17 = arith.constant 0.000000e+00 : f32
    %25 = vector.broadcast %cst_17 : f32 to vector<8x128xf32>
    %26 = arith.maximumf %24, %25 : vector<8x128xf32>
    %27 = arith.truncf %26 : vector<8x128xf32> to vector<8x128xbf16>
    %c0_18 = arith.constant 0 : index
    %c0_19 = arith.constant 0 : index
    %28 = vector.load %arg8[%c0_18, %c0_19] : memref<128x128xbf16, #tpu.memory_space<vmem>>, vector<128x128xbf16>
    %cst_20 = arith.constant dense<0.000000e+00> : vector<8x128xf32>
    %29 = tpu.matmul %27, %28, %cst_20 {dimension_numbers = #tpu.dot_dimension_numbers<[1], [0], [0], [1], [0, 0, 1, 1], [], []>} : vector<8x128xbf16>, vector<128x128xbf16>, vector<8x128xf32> -> vector<8x128xf32>
    %c0_21 = arith.constant 0 : index
    %c0_22 = arith.constant 0 : index
    %30 = vector.load %arg9[%c0_21, %c0_22] : memref<1x128xf32, #tpu.memory_space<vmem>>, vector<1x128xf32>
    %31 = vector.broadcast %30 : vector<1x128xf32> to vector<8x128xf32>
    %32 = arith.addf %29, %31 : vector<8x128xf32>
    %c0_23 = arith.constant 0 : index
    %c0_24 = arith.constant 0 : index
    %33 = vector.load %arg10[%c0_23, %c0_24] : memref<8x128xf32, #tpu.memory_space<vmem>>, vector<8x128xf32>
    tpu.vector_store %arg10[%c0_23, %c0_24], %32 {strides = array<i32>} : memref<8x128xf32, #tpu.memory_space<vmem>>, vector<8x128xf32>,
    return
  }
  func.func @transform_0(%arg0: i32) -> (i32, i32) {
    %c0_i32 = arith.constant 0 : i32
    %c0_i32_0 = arith.constant 0 : i32
    return %arg0, %c0_i32 : i32, i32
  }
  func.func @transform_1(%arg0: i32) -> (i32, i32) {
    %c0_i32 = arith.constant 0 : i32
    %c0_i32_0 = arith.constant 0 : i32
    %c0_i32_1 = arith.constant 0 : i32
    return %c0_i32, %c0_i32_0 : i32, i32
  }
  func.func @transform_2(%arg0: i32) -> (i32, i32) {
    %c0_i32 = arith.constant 0 : i32
    %c0_i32_0 = arith.constant 0 : i32
    %c0_i32_1 = arith.constant 0 : i32
    return %c0_i32, %c0_i32_0 : i32, i32
  }
  func.func @transform_3(%arg0: i32) -> (i32, i32) {
    %c0_i32 = arith.constant 0 : i32
    %c0_i32_0 = arith.constant 0 : i32
    %c0_i32_1 = arith.constant 0 : i32
    return %c0_i32, %c0_i32_0 : i32, i32
  }
  func.func @transform_4(%arg0: i32) -> (i32, i32) {
    %c0_i32 = arith.constant 0 : i32
    %c0_i32_0 = arith.constant 0 : i32
    %c0_i32_1 = arith.constant 0 : i32
    return %c0_i32, %c0_i32_0 : i32, i32
  }
  func.func @transform_5(%arg0: i32) -> (i32, i32) {
    %c0_i32 = arith.constant 0 : i32
    %c0_i32_0 = arith.constant 0 : i32
    %c0_i32_1 = arith.constant 0 : i32
    return %c0_i32, %c0_i32_0 : i32, i32
  }
  func.func @transform_6(%arg0: i32) -> (i32, i32) {
    %c0_i32 = arith.constant 0 : i32
    %c0_i32_0 = arith.constant 0 : i32
    %c0_i32_1 = arith.constant 0 : i32
    return %c0_i32, %c0_i32_0 : i32, i32
  }
  func.func @transform_7(%arg0: i32) -> (i32, i32) {
    %c0_i32 = arith.constant 0 : i32
    %c0_i32_0 = arith.constant 0 : i32
    %c0_i32_1 = arith.constant 0 : i32
    return %c0_i32, %c0_i32_0 : i32, i32
  }
  func.func @transform_8(%arg0: i32) -> (i32, i32) {
    %c0_i32 = arith.constant 0 : i32
    %c0_i32_0 = arith.constant 0 : i32
    %c0_i32_1 = arith.constant 0 : i32
    return %c0_i32, %c0_i32_0 : i32, i32
  }
  func.func @transform_9(%arg0: i32) -> (i32, i32) {
    %c0_i32 = arith.constant 0 : i32
    %c0_i32_0 = arith.constant 0 : i32
    return %arg0, %c0_i32 : i32, i32
  }
}

</mosaic_0001>

<bundles_post_ra>
// kernel: tpu_custom_call.1
= control target key start
LH: loop header
LB: loop body
LE: loop exit
PB: predicated region body
PF: predicated region fallthrough
CT: control target
= control target key end

     0   :  { %14 = vsyncpa [#allocation3], 0  ;;  %s1625_s0 = inlined_call_operand.hbm [shape: bf16[8,896], index: 0, kind: input, shape index: {}]   ;;  %s1626_s1 = inlined_call_operand.hbm [shape: bf16[896,128], index: 1, kind: input, shape index: {}]   ;;  %s1627_s2 = inlined_call_operand.vmem [shape: f32[1,128], index: 2, kind: input, shape index: {}]   ;;  %s1628_s3 = inlined_call_operand.hbm [shape: bf16[128,128], index: 3, kind: input, shape index: {}]   ;;  %s1629_s4 = inlined_call_operand.vmem [shape: f32[1,128], index: 4, kind: input, shape index: {}]   ;;  %s1630_s5 = inlined_call_operand.hbm [shape: bf16[128,128], index: 5, kind: input, shape index: {}]   ;;  %s1631_s6 = inlined_call_operand.vmem [shape: f32[1,128], index: 6, kind: input, shape index: {}]   ;;  %s1632_s7 = inlined_call_operand.hbm [shape: bf16[128,128], index: 7, kind: input, shape index: {}]   ;;  %s1633_s8 = inlined_call_operand.vmem [shape: f32[1,128], index: 8, kind: input, shape index: {}]   ;;  %s1634_s9 = inlined_call_operand.hbm [shape: f32[8,128], index: 9, kind: output, shape index: {}]  }
   0x1   :  { %15 = vsyncpa [#allocation6], 0 }
   0x2   :  { %16 = vsyncpa [#allocation9], 0  ;;  %s33_s11 = sshll.u32 %s1626_s1, 4  ;;  %s34_s11 = int_to_ptr.hbm [resolvable:$true] %s33_s11 }
   0x3   :  { %17 = vsyncpa [#allocation4], 0  ;;  %s1537_s12 = smov [#allocation5]   ;;  %s63_s16 = sshll.u32 %s1630_s5, 4  ;;  %s64_s16 = int_to_ptr.hbm [resolvable:$true] %s63_s16 }
   0x4   :  { %s35_s13 = sshll.u32 %s1537_s12, 4  ;;  %s1538_s17 = smov 64   ;;  %s36_s13 = int_to_ptr.vmem [resolvable:$true] %s35_s13 }
   0x5   :  { %s1539_s18 = smov 4   ;;  %s1540_s19 = smov [#allocation8]  }
   0x6   :  { %41 = dma.hbm_to_vmem [thread:$0]  %s34_s11, 7168, %s36_s13, [#allocation6], %s1538_s17, %s1538_s17, %s1539_s18  }
   0x7   :  { %s65_s20 = sshll.u32 %s1540_s19, 4  ;;  %s23_s23 = sshll.u32 %s1625_s0, 4  ;;  %s66_s20 = int_to_ptr.vmem [resolvable:$true] %s65_s20  ;;  %s24_s23 = int_to_ptr.hbm [resolvable:$true] %s23_s23 }
   0x8   :  { %71 = dma.hbm_to_vmem [thread:$0]  %s64_s16, 1024, %s66_s20, [#allocation9], %s1538_s17, %s1538_s17, %s1539_s18  }
   0x9   :  { %s48_s25 = sshll.u32 %s1628_s3, 4  ;;  %s1541_s26 = smov [#allocation2]   ;;  %s49_s25 = int_to_ptr.hbm [resolvable:$true] %s48_s25 }
   0xa   :  { %s25_s27 = sshll.u32 %s1541_s26, 4  ;;  %s1542_s5 = smov [#allocation7]   ;;  %s26_s27 = int_to_ptr.vmem [resolvable:$true] %s25_s27 }
   0xb   :  { %28 = dma.hbm_to_vmem [thread:$0]  %s24_s23, 448, %s26_s27, [#allocation3]  }
   0xc   :  { %s50_s28 = sshll.u32 %s1542_s5, 4  ;;  %s78_s10 = sshll.u32 %s1632_s7, 4  ;;  %s51_s28 = int_to_ptr.vmem [resolvable:$true] %s50_s28  ;;  %s79_s10 = int_to_ptr.hbm [resolvable:$true] %s78_s10 }
   0xd   :  { %56 = dma.hbm_to_vmem [thread:$0]  %s49_s25, 1024, %s51_s28, [#allocation6], %s1538_s17, %s1538_s17, %s1539_s18  }
   0xe   :  { %s1543_s0 = smov [#allocation10]  }
   0xf   :  { %s80_s11 = sshll.u32 %s1543_s0, 4  ;;  %s81_s11 = int_to_ptr.vmem [resolvable:$true] %s80_s11 }
  0x10   :  { %86 = dma.hbm_to_vmem [thread:$0]  %s79_s10, 1024, %s81_s11, [#allocation9], %s1538_s17, %s1538_s17, %s1539_s18  }
  0x11   :  { %1529 = dma.done.wait [#allocation3], 448  }
  0x12   :  { %1530 = vsyncadd [#allocation3], 4294966848 }
  0x13   :  { %1531 = dma.done.wait [#allocation6], 8192  }
  0x14   :  { %1532 = vsyncadd [#allocation6], 4294959104 }
  0x15   :  { %1533 = dma.done.wait [#allocation9], 2048  }
  0x16   :  { %1534 = vsyncadd [#allocation9], 4294965248  ;;  %v1296_v0 = vld [vmem:[#allocation5 + $0x38] sm:$0xff]  ;;  %v1295_v3 = vld [vmem:[#allocation5 + $0x30] sm:$0xff]  ;;  %s1544_s16 = smov [#allocation11]   ;;  %s956_s20 = sshll.u32 %s1634_s9, 4  ;;  %s957_s20 = int_to_ptr.hbm [resolvable:$true] %s956_s20 }
  0x17   :  { %v1304_v1 = vld [vmem:[#allocation5 + $0x78] sm:$0xff]  ;;  %590 = vmatpush.bf16.msra.mxu0 %v1296_v0  ;;  %v1303_v4 = vld [vmem:[#allocation5 + $0x70] sm:$0xff]  ;;  %v1294_v7 = vld [vmem:[#allocation5 + $0x28] sm:$0xff]  ;;  %s954_s17 = sshll.u32 %s1544_s16, 4  ;;  %s955_s17 = int_to_ptr.vmem [resolvable:$true] %s954_s17 }
  0x18   :  { %v1312_v2 = vld [vmem:[#allocation5 + $0xb8] sm:$0xff]  ;;  %603 = vmatpush.bf16.msra.mxu1 %v1304_v1  ;;  %v1311_v5 = vld [vmem:[#allocation5 + $0xb0] sm:$0xff]  ;;  %v1302_v8 = vld [vmem:[#allocation5 + $0x68] sm:$0xff] }
  0x19   :  { %616 = vmatpush.bf16.msra.mxu2 %v1312_v2  ;;  %v1320_v6 = vld [vmem:[#allocation5 + $0xf8] sm:$0xff]  ;;  %v1310_v9 = vld [vmem:[#allocation5 + $0xa8] sm:$0xff]  ;;  %v1319_v10 = vld [vmem:[#allocation5 + $0xf0] sm:$0xff] }
  0x1a   :  { %629 = vmatpush.bf16.msra.mxu3 %v1320_v6  ;;  %v1293_v11 = vld [vmem:[#allocation5 + $0x20] sm:$0xff]  ;;  %v1318_v14 = vld [vmem:[#allocation5 + $0xe8] sm:$0xff]  ;;  %v1292_v15 = vld [vmem:[#allocation5 + $0x18] sm:$0xff] }
  0x1b   :  { %591 = vmatpush.bf16.msra.mxu0 %v1295_v3  ;;  %v1301_v12 = vld [vmem:[#allocation5 + $0x60] sm:$0xff]  ;;  %v1300_v16 = vld [vmem:[#allocation5 + $0x58] sm:$0xff]  ;;  %v1291_v19 = vld [vmem:[#allocation5 + $0x10] sm:$0xff] }
  0x1c   :  { %604 = vmatpush.bf16.msra.mxu1 %v1303_v4  ;;  %v1309_v13 = vld [vmem:[#allocation5 + $0xa0] sm:$0xff]  ;;  %v1308_v17 = vld [vmem:[#allocation5 + $0x98] sm:$0xff]  ;;  %v1299_v20 = vld [vmem:[#allocation5 + $0x50] sm:$0xff] }
  0x1d   :  { %617 = vmatpush.bf16.msra.mxu2 %v1311_v5  ;;  %v1317_v18 = vld [vmem:[#allocation5 + $0xe0] sm:$0xff]  ;;  %v1307_v21 = vld [vmem:[#allocation5 + $0x90] sm:$0xff]  ;;  %v1316_v22 = vld [vmem:[#allocation5 + $0xd8] sm:$0xff] }
  0x1e   :  { %630 = vmatpush.bf16.msra.mxu3 %v1319_v10  ;;  %v1290_v23 = vld [vmem:[#allocation5 + $0x8] sm:$0xff]  ;;  %v1315_v27 = vld [vmem:[#allocation5 + $0xd0] sm:$0xff]  ;;  %v1289_v30 = vld [vmem:[#allocation5] sm:$0xff] }
  0x1f   :  { %592 = vmatpush.bf16.msra.mxu0 %v1294_v7  ;;  %v1298_v24 = vld [vmem:[#allocation5 + $0x48] sm:$0xff]  ;;  %v1297_v31 = vld [vmem:[#allocation5 + $0x40] sm:$0xff]  ;;  %v1328_v35 = vld [vmem:[#allocation5 + $0x138] sm:$0xff] }
  0x20   :  { %605 = vmatpush.bf16.msra.mxu1 %v1302_v8  ;;  %v109_v25 = vld [vmem:[#allocation2] sm:$0xff]  ;;  %v110_v28 = vld [vmem:[#allocation2 + $0x8] sm:$0xff]  ;;  %v1336_v36 = vld [vmem:[#allocation5 + $0x178] sm:$0xff] }
  0x21   :  { %618 = vmatpush.bf16.msra.mxu2 %v1310_v9  ;;  %v1306_v26 = vld [vmem:[#allocation5 + $0x88] sm:$0xff]  ;;  %v233_v29 = vunpack.c.l.b16 %v109_v25  ;;  %v235_v32 = vunpack.c.l.b16 %v110_v28  ;;  %v234_v33 = vunpack.c.h.b16 %v109_v25  ;;  %v1305_v34 = vld [vmem:[#allocation5 + $0x80] sm:$0xff]  ;;  %v1344_v37 = vld [vmem:[#allocation5 + $0x1b8] sm:$0xff]  ;;  %v236_v46 = vunpack.c.h.b16 %v110_v28 }
  0x22   :  { %631 = vmatpush.bf16.msra.mxu3 %v1318_v14  ;;  %v1314_v39 = vld [vmem:[#allocation5 + $0xc8] sm:$0xff]  ;;  %v1327_v42 = vld [vmem:[#allocation5 + $0x130] sm:$0xff]  ;;  %v1313_v45 = vld [vmem:[#allocation5 + $0xc0] sm:$0xff] }
  0x23   :  { %593 = vmatpush.bf16.msra.mxu0 %v1293_v11  ;;  %v240_v38 = vpack.c.b16 %v233_v29, %v233_v29  ;;  %v242_v40 = vpack.c.b16 %v235_v32, %v235_v32  ;;  %v241_v41 = vpack.c.b16 %v234_v33, %v234_v33  ;;  %v1335_v43 = vld [vmem:[#allocation5 + $0x170] sm:$0xff]  ;;  %v1326_v47 = vld [vmem:[#allocation5 + $0x128] sm:$0xff]  ;;  %v243_v50 = vpack.c.b16 %v236_v46, %v236_v46  ;;  %v1325_v51 = vld [vmem:[#allocation5 + $0x120] sm:$0xff] }
  0x24   :  { %606 = vmatpush.bf16.msra.mxu1 %v1301_v12  ;;  %v1343_v44 = vld [vmem:[#allocation5 + $0x1b0] sm:$0xff]  ;;  %v1334_v48 = vld [vmem:[#allocation5 + $0x168] sm:$0xff]  ;;  %v1333_v52 = vld [vmem:[#allocation5 + $0x160] sm:$0xff] }
  0x25   :  { %619 = vmatpush.bf16.msra.mxu2 %v1309_v13  ;;  %v1342_v49 = vld [vmem:[#allocation5 + $0x1a8] sm:$0xff]  ;;  %v1341_v53 = vld [vmem:[#allocation5 + $0x1a0] sm:$0xff]  ;;  %v1324_v54 = vld [vmem:[#allocation5 + $0x118] sm:$0xff] }
  0x26   :  { %632 = vmatpush.bf16.msra.mxu3 %v1317_v18  ;;  %v1332_v55 = vld [vmem:[#allocation5 + $0x158] sm:$0xff]  ;;  %v1323_v57 = vld [vmem:[#allocation5 + $0x110] sm:$0xff]  ;;  %v1322_v60 = vld [vmem:[#allocation5 + $0x108] sm:$0xff] }
  0x27   :  { %594 = vmatpush.bf16.msra.mxu0 %v1292_v15  ;;  %v1340_v56 = vld [vmem:[#allocation5 + $0x198] sm:$0xff]  ;;  %v1331_v58 = vld [vmem:[#allocation5 + $0x150] sm:$0xff]  ;;  %v1330_v62 = vld [vmem:[#allocation5 + $0x148] sm:$0xff] }
  0x28   :  { %607 = vmatpush.bf16.msra.mxu1 %v1300_v16  ;;  %v1339_v59 = vld [vmem:[#allocation5 + $0x190] sm:$0xff]  ;;  %v1338_v63 = vld [vmem:[#allocation5 + $0x188] sm:$0xff]  ;;  %v112_v0 = vld [vmem:[#allocation2 + $0x18] sm:$0xf] }
  0x29   :  { %620 = vmatpush.bf16.msra.mxu2 %v1308_v17  ;;  %v111_v61 = vld [vmem:[#allocation2 + $0x10] sm:$0xff]  ;;  %v1321_v2 = vld [vmem:[#allocation5 + $0x100] sm:$0xff]  ;;  %v239_v4 = vunpack.c.l.b16 %v112_v0  ;;  %v1350_v12 = vld [vmem:[#allocation7 + $0x28] sm:$0xff] }
  0x2a   :  { %633 = vmatpush.bf16.msra.mxu3 %v1316_v22  ;;  %v237_v1 = vunpack.c.l.b16 %v111_v61  ;;  %v238_v3 = vunpack.c.h.b16 %v111_v61  ;;  %v1329_v5 = vld [vmem:[#allocation5 + $0x140] sm:$0xff]  ;;  %v1352_v10 = vld [vmem:[#allocation7 + $0x38] sm:$0xff]  ;;  %v1351_v11 = vld [vmem:[#allocation7 + $0x30] sm:$0xff] }
  0x2b   :  { %595 = vmatpush.bf16.msra.mxu0 %v1291_v19  ;;  %v1337_v6 = vld [vmem:[#allocation5 + $0x180] sm:$0xff]  ;;  %v246_v9 = vpack.c.b16 %v239_v4, %v239_v4  ;;  %v1348_v14 = vld [vmem:[#allocation7 + $0x18] sm:$0xff]  ;;  %v1347_v15 = vld [vmem:[#allocation7 + $0x10] sm:$0xff] }
  0x2c   :  { %608 = vmatpush.bf16.msra.mxu1 %v1299_v20  ;;  %v244_v7 = vpack.c.b16 %v237_v1, %v237_v1  ;;  %v245_v8 = vpack.c.b16 %v238_v3, %v238_v3  ;;  %v1349_v13 = vld [vmem:[#allocation7 + $0x20] sm:$0xff]  ;;  %v1346_v18 = vld [vmem:[#allocation7 + $0x8] sm:$0xff]  ;;  %v1356_v46 = vld [vmem:[#allocation8 + $0x18] sm:$0xff] }
  0x2d   :  { %621 = vmatpush.bf16.msra.mxu2 %v1307_v21  ;;  %v1345_v19 = vld [vmem:[#allocation7] sm:$0xff]  ;;  %v1364_v61 = vld [vmem:[#allocation10 + $0x18] sm:$0xff] }
  0x2e   :  { %634 = vmatpush.bf16.msra.mxu3 %v1315_v27 }
  0x2f   :  { %596 = vmatpush.bf16.msra.mxu0 %v1290_v23  ;;  %v1377_v23 = vld [vmem:[%s1627_s2] ss:$0 sm:$0xff] }
  0x30   :  { %609 = vmatpush.bf16.msra.mxu1 %v1298_v24 }
  0x31   :  { %622 = vmatpush.bf16.msra.mxu2 %v1306_v26 }
  0x32   :  { %635 = vmatpush.bf16.msra.mxu3 %v1314_v39 }
  0x33   :  { %597 = vmatpush.bf16.msra.mxu0 %v1289_v30 }
  0x34   :  { %610 = vmatpush.bf16.msra.mxu1 %v1297_v31 }
  0x35   :  { %623 = vmatpush.bf16.msra.mxu2 %v1305_v34 }
  0x36   :  { %598 = vmatmul.bf16.vlgmr.msra.gmra.mxu0 %v240_v38  ;;  %636 = vmatpush.bf16.msra.mxu3 %v1313_v45  ;;  %v1357_v45 = vld [vmem:[#allocation8 + $0x20] sm:$0xff] }
  0x37   :  { %642 = vmatpush.bf16.msrb.mxu0 %v1328_v35  ;;  %611 = vmatmul.bf16.vlgmr.msra.gmra.mxu1 %v241_v41 }
  0x38   :  { %655 = vmatpush.bf16.msrb.mxu1 %v1336_v36  ;;  %624 = vmatmul.bf16.vlgmr.msra.gmra.mxu2 %v242_v40 }
  0x39   :  { %668 = vmatpush.bf16.msrb.mxu2 %v1344_v37  ;;  %637 = vmatmul.bf16.vlgmr.msra.gmra.mxu3 %v243_v50  ;;  %v1378_v50 = vld [vmem:[%s1629_s4] ss:$0 sm:$0xff] }
  0x3a   :  { %751 = vmatpush.bf16.msrb.mxu3 %v1352_v10  ;;  %v1362_v10 = vld [vmem:[#allocation10 + $0x8] sm:$0xff] }
  0x3b   :  { %643 = vmatpush.bf16.msrb.mxu0 %v1327_v42  ;;  %v1360_v42 = vld [vmem:[#allocation8 + $0x38] sm:$0xff] }
  0x3c   :  { %656 = vmatpush.bf16.msrb.mxu1 %v1335_v43  ;;  %v1359_v43 = vld [vmem:[#allocation8 + $0x30] sm:$0xff] }
  0x3d   :  { %669 = vmatpush.bf16.msrb.mxu2 %v1343_v44  ;;  %v1358_v44 = vld [vmem:[#allocation8 + $0x28] sm:$0xff] }
  0x3e   :  { %752 = vmatpush.bf16.msrb.mxu3 %v1351_v11  ;;  %v1361_v11 = vld [vmem:[#allocation10] sm:$0xff] }
  0x3f   :  { %644 = vmatpush.bf16.msrb.mxu0 %v1326_v47  ;;  %v1355_v47 = vld [vmem:[#allocation8 + $0x10] sm:$0xff] }
  0x40   :  { %657 = vmatpush.bf16.msrb.mxu1 %v1334_v48  ;;  %v1354_v48 = vld [vmem:[#allocation8 + $0x8] sm:$0xff] }
  0x41   :  { %670 = vmatpush.bf16.msrb.mxu2 %v1342_v49  ;;  %v1353_v49 = vld [vmem:[#allocation8] sm:$0xff] }
  0x42   :  { %753 = vmatpush.bf16.msrb.mxu3 %v1350_v12  ;;  %v1379_v12 = vld [vmem:[%s1631_s6] ss:$0 sm:$0xff] }
  0x43   :  { %645 = vmatpush.bf16.msrb.mxu0 %v1325_v51 }
  0x44   :  { %658 = vmatpush.bf16.msrb.mxu1 %v1333_v52 }
  0x45   :  { %671 = vmatpush.bf16.msrb.mxu2 %v1341_v53  ;;  %v1368_v53 = vld [vmem:[#allocation10 + $0x38] sm:$0xff] }
  0x46   :  { %754 = vmatpush.bf16.msrb.mxu3 %v1349_v13 }
  0x47   :  { %646 = vmatpush.bf16.msrb.mxu0 %v1324_v54 }
  0x48   :  { %659 = vmatpush.bf16.msrb.mxu1 %v1332_v55  ;;  %v1367_v55 = vld [vmem:[#allocation10 + $0x30] sm:$0xff] }
  0x49   :  { %672 = vmatpush.bf16.msrb.mxu2 %v1340_v56  ;;  %v1366_v56 = vld [vmem:[#allocation10 + $0x28] sm:$0xff] }
  0x4a   :  { %755 = vmatpush.bf16.msrb.mxu3 %v1348_v14 }
  0x4b   :  { %647 = vmatpush.bf16.msrb.mxu0 %v1323_v57 }
  0x4c   :  { %660 = vmatpush.bf16.msrb.mxu1 %v1331_v58 }
  0x4d   :  { %673 = vmatpush.bf16.msrb.mxu2 %v1339_v59  ;;  %v1365_v59 = vld [vmem:[#allocation10 + $0x20] sm:$0xff] }
  0x4e   :  { %756 = vmatpush.bf16.msrb.mxu3 %v1347_v15 }
  0x4f   :  { %648 = vmatpush.bf16.msrb.mxu0 %v1322_v60 }
  0x50   :  { %661 = vmatpush.bf16.msrb.mxu1 %v1330_v62  ;;  %v1363_v62 = vld [vmem:[#allocation10 + $0x10] sm:$0xff] }
  0x51   :  { %674 = vmatpush.bf16.msrb.mxu2 %v1338_v63 }
  0x52   :  { %757 = vmatpush.bf16.msrb.mxu3 %v1346_v18  ;;  %v1380_v18 = vld [vmem:[%s1633_s8] ss:$0 sm:$0xff] }
  0x53   :  { %649 = vmatpush.bf16.msrb.mxu0 %v1321_v2 }
  0x54   :  { %662 = vmatpush.bf16.msrb.mxu1 %v1329_v5 }
  0x55   :  { %675 = vmatpush.bf16.msrb.mxu2 %v1337_v6 }
  0x56   :  { %650 = vmatmul.bf16.vlgmr.msrb.gmra.mxu0 %v244_v7  ;;  %758 = vmatpush.bf16.msrb.mxu3 %v1345_v19 }
  0x57   :  { %663 = vmatmul.bf16.vlgmr.msrb.gmra.mxu1 %v245_v8  ;;  %852 = vmatpush.bf16.msra.mxu0 %v1360_v42 }
  0x58   :  { %676 = vmatmul.bf16.vlgmr.msrb.gmra.mxu2 %v246_v9  ;;  %935 = vmatpush.bf16.msra.mxu1 %v1368_v53 }
  0x5b   :  { %853 = vmatpush.bf16.msra.mxu0 %v1359_v43 }
  0x5c   :  { %936 = vmatpush.bf16.msra.mxu1 %v1367_v55 }
  0x5f   :  { %854 = vmatpush.bf16.msra.mxu0 %v1358_v44 }
  0x60   :  { %937 = vmatpush.bf16.msra.mxu1 %v1366_v56 }
  0x63   :  { %855 = vmatpush.bf16.msra.mxu0 %v1357_v45 }
  0x64   :  { %938 = vmatpush.bf16.msra.mxu1 %v1365_v59 }
  0x67   :  { %856 = vmatpush.bf16.msra.mxu0 %v1356_v46 }
  0x68   :  { %939 = vmatpush.bf16.msra.mxu1 %v1364_v61 }
  0x6b   :  { %857 = vmatpush.bf16.msra.mxu0 %v1355_v47 }
  0x6c   :  { %940 = vmatpush.bf16.msra.mxu1 %v1363_v62 }
  0x6f   :  { %858 = vmatpush.bf16.msra.mxu0 %v1354_v48 }
  0x70   :  { %941 = vmatpush.bf16.msra.mxu1 %v1362_v10 }
  0x73   :  { %859 = vmatpush.bf16.msra.mxu0 %v1353_v49 }
  0x74   :  { %942 = vmatpush.bf16.msra.mxu1 %v1361_v11 }
  0xb3   :  { %v599_v16 = vpop.f32.mrf.mxu0 }
  0xb4   :  { %v612_v17 = vpop.f32.mrf.mxu1  ;;  %v600_v26 = vadd.f32 %v1377_v23, %v599_v16 }
  0xb6   :  { %v613_v27 = vadd.f32 %v612_v17, %v600_v26 }
  0xbb   :  { %v625_v20 = vpop.f32.mrf.mxu2  ;;  %v601_v21 = vpop.f32.mrf.mxu0 }
  0xbc   :  { %v614_v22 = vpop.f32.mrf.mxu1  ;;  %v638_v24 = vpop.f32.mrf.mxu3  ;;  %v626_v29 = vadd.f32 %v625_v20, %v613_v27 }
  0xbe   :  { %v639_v30 = vadd.f32 %v638_v24, %v626_v29 }
  0xc3   :  { %v627_v25 = vpop.f32.mrf.mxu2 }
  0xc4   :  { %v640_v28 = vpop.f32.mrf.mxu3 }
  0xd3   :  { %v651_v31 = vpop.f32.mrf.mxu0 }
  0xd4   :  { %v664_v32 = vpop.f32.mrf.mxu1  ;;  %v652_v33 = vadd.f32 %v651_v31, %v639_v30 }
  0xd6   :  { %v665_v34 = vadd.f32 %v664_v32, %v652_v33 }
  0xdb   :  { %v677_v35 = vpop.f32.mrf.mxu2  ;;  %v653_v37 = vpop.f32.mrf.mxu0 }
  0xdc   :  { %v678_v36 = vadd.f32 %v677_v35, %v665_v34  ;;  %v666_v38 = vpop.f32.mrf.mxu1 }
  0xde   :  { %v681_v39 = vmax.f32 %v678_v36, 0.0 }
  0xe0   :  { %v682_v40 = vpack.c.bf16 %v681_v39, %v681_v39 }
  0xe2   :  { %759 = vmatmul.bf16.vlgmr.msrb.gmra.mxu3 %v682_v40 }
  0xe3   :  { %v679_v41 = vpop.f32.mrf.mxu2 }
 0x165   :  { %v760_v51 = vpop.f32.mrf.mxu3 }
 0x166   :  { %v761_v52 = vadd.f32 %v1378_v50, %v760_v51 }
 0x168   :  { %v1224_v54 = vmul.f32 -1.442695, %v761_v52 }
 0x16a   :  { %1381 = vpow2.f32 %v1224_v54 }
 0x16d   :  { %v762_v57 = vpop.f32.mrf.mxu3 }
 0x170   :  { %v1382_v58 = vpop.eup %1381 }
 0x171   :  { %v767_v60 = vadd.f32 1.0, %v1382_v58 }
 0x173   :  { %1383 = vrcp.f32 %v767_v60  ;;  %v779_v2 = vand.u32 2147483648, %v767_v60  ;;  %v777_v4 = vand.u32 2147483647, %v767_v60  ;;  %vm773_vm1 = vweird.f32 %v767_v60 }
 0x175   :  { %v780_v6 = vor.u32 1.1754944e-38, %v779_v2  ;;  %vm778_vm3 = vcmp.eq.f32.partialorder %v777_v4, 8.507059e+37 }
 0x179   :  { %v1384_v63 = vpop.eup %1383 }
 0x17a   :  { %v769_v0 = vmul.f32 %v1384_v63, %v767_v60  ;;  %vm774_vm0 = vweird.f32 %v1384_v63 }
 0x17b   :  { %vm775_vm2 = vmor %vm773_vm1, %vm774_vm0 }
 0x17c   :  { %v770_v1 = vsub.f32 1.0, %v769_v0 }
 0x17e   :  { %v771_v3 = vmul.f32 %v1384_v63, %v770_v1 }
 0x180   :  { %v772_v5 = vadd.f32 %v1384_v63, %v771_v3 }
 0x182   :  { %v776_v7 = vsel %vm775_vm2, %v1384_v63, %v772_v5 }
 0x183   :  { %v781_v8 = vsel %vm778_vm3, %v780_v6, %v776_v7 }
 0x184   :  { %v783_v9 = vpack.c.bf16 %v781_v8, %v781_v8 }
 0x186   :  { %860 = vmatmul.bf16.vlgmr.msra.gmra.mxu0 %v783_v9 }
 0x203   :  { %v861_v13 = vpop.f32.mrf.mxu0 }
 0x204   :  { %v862_v14 = vadd.f32 %v1379_v12, %v861_v13 }
 0x206   :  { %v865_v15 = vmax.f32 %v862_v14, 0.0 }
 0x208   :  { %v866_v16 = vpack.c.bf16 %v865_v15, %v865_v15 }
 0x20a   :  { %943 = vmatmul.bf16.vlgmr.msra.gmra.mxu1 %v866_v16 }
 0x20b   :  { %v863_v17 = vpop.f32.mrf.mxu0 }
 0x287   :  { %v944_v19 = vpop.f32.mrf.mxu1 }
 0x288   :  { %v945_v20 = vadd.f32 %v1380_v18, %v944_v19 }
 0x28a   :  { %948 = vst [vmem:[#allocation11] sm:$0xff] %v945_v20 }
 0x28b   :  { %959 = dma.vmem_to_hbm [thread:$0]  %s955_s17, 128, %s957_s20, [#allocation4]  }
 0x28f   :  { %v946_v21 = vpop.f32.mrf.mxu1 }
 0x290   :  { %1535 = dma.done.wait [#allocation4], 128  }
 0x291   :  { %1536 = vsyncadd [#allocation4], 4294967168 }
 0x292   :  { %964 = vsyncpa [#allocation3], 1 }
 0x293   :  { %965 = vsyncpa [#allocation6], 1 }
 0x294   :  { %966 = vsyncpa [#allocation9], 1 }
 0x295   :  { %967 = vsyncpa [#allocation4], 1 }

</bundles_post_ra>
